<compile_context>
chip_gen: v5e
topology: v5e:2x2
jax: 0.10.0
libtpu: 0.0.40
codegen_flags: <defaults>
</compile_context>

<pallas_src>
import jax
import jax.numpy as jnp
import numpy as np
from jax.experimental import pallas as pl
from jax.experimental.pallas import tpu as pltpu

NEG_FILL = -1e9  # matches masked_fill(..., -1000000000.0)


def qa_head_kernel(ds_ref, h_ref, w_ref, b_ref, m_ref, out_ref):
    # ds_ref : SMEM scalar-prefetch (B,) int32 dataset ids
    # h_ref  : (1, S, D)  hidden states for this example
    # w_ref  : (1, 2, D)  head weight selected by this example's dataset id
    # b_ref  : (K, 2, 1)  ALL head biases (single DMA, constant index_map)
    # m_ref  : (1, 1, S)  context mask (int32, 0/1), lane-dense
    # out_ref: (1, 2, S)  row 0 = start_log_probs, row 1 = end_log_probs
    ds = ds_ref[pl.program_id(0)]      # this example's dataset / head id
    h = h_ref[0]                       # (S, D)
    w = w_ref[0]                       # (2, D)
    b = b_ref[ds]                      # (2, 1)  dynamic pick of this head's bias
    m = m_ref[0]                       # (1, S)

    # QA head linear, lane-dense: contract D on both operands -> (2, S) logits
    # (same structure as the attention q @ k.T pattern), f32 accumulation.
    logits = jax.lax.dot_general(
        w, h,
        dimension_numbers=(((1,), (1,)), ((), ())),
        preferred_element_type=jnp.float32,
    ) + b                              # (2, S) + (2, 1) lane broadcast

    # masked_fill(~context_mask, -1e9); mask broadcasts over the 2 rows.
    masked = jnp.where(m != 0, logits, NEG_FILL)

    # log_softmax over the sequence axis (now the lane axis), numerically stable.
    mx = jnp.max(masked, axis=-1, keepdims=True)                        # (2, 1)
    lse = jnp.log(jnp.sum(jnp.exp(masked - mx), axis=-1, keepdims=True)) + mx
    out_ref[0] = masked - lse          # dense (2, S) store


def made_qa_heads(hidden, head_w, head_b, context_mask, datasets):
    """hidden: (B,S,D) f32 or bf16; head_w: (K,2,D) stacked nn.Linear weights;
    head_b: (K,2); context_mask: (B,S) bool; datasets: (B,) int32 head id per
    example.

    Contract: keep `datasets` grouped (as Counter/BatchSplit implies) so
    consecutive grid steps map to the same weight block and its DMA is skipped.
    """
    B, S, D = hidden.shape
    K = head_w.shape[0]
    mask3 = context_mask.astype(jnp.int32).reshape(B, 1, S)      # lane-dense
    bias3 = head_b.astype(jnp.float32).reshape(K, 2, 1)
    w_in = head_w.astype(hidden.dtype)                           # bf16-friendly

    out = pl.pallas_call(
        qa_head_kernel,
        out_shape=jax.ShapeDtypeStruct((B, 2, S), jnp.float32),
        grid_spec=pltpu.PrefetchScalarGridSpec(
            num_scalar_prefetch=1,
            grid=(B,),
            in_specs=[
                pl.BlockSpec((1, S, D), lambda b, ds: (b, 0, 0)),       # hidden
                pl.BlockSpec((1, 2, D), lambda b, ds: (ds[b], 0, 0)),   # head W
                pl.BlockSpec((K, 2, 1), lambda b, ds: (0, 0, 0)),       # biases (once)
                pl.BlockSpec((1, 1, S), lambda b, ds: (b, 0, 0)),       # mask
            ],
            out_specs=pl.BlockSpec((1, 2, S), lambda b, ds: (b, 0, 0)),
        ),
        compiler_params=pltpu.CompilerParams(
            dimension_semantics=("parallel",)),   # B-axis has no carry -> v7x 2 TCs
    )(datasets, hidden, w_in, bias3, mask3)

    start_log_probs = out[:, 0, :]
    end_log_probs = out[:, 1, :]
    return start_log_probs, end_log_probs


def reference_qa_heads(hidden, head_w, head_b, context_mask, datasets):
    """Pure-JAX reference of the same batch_forward semantics."""
    w_sel = head_w[datasets]                       # (B, 2, D)
    b_sel = head_b[datasets][:, None, :]           # (B, 1, 2)
    logits = jnp.einsum("bsd,bed->bse", hidden, w_sel) + b_sel
    masked = jnp.where(context_mask[..., None], logits, NEG_FILL)
    logp = jax.nn.log_softmax(masked, axis=1)
    return logp[..., 0], logp[..., 1]


if __name__ == "__main__":
    # Small but tile-friendly shapes. hidden_size=D, seq=S, batch=B, K adapters.
    B, S, D, K = 4, 128, 64, 2

    key = jax.random.PRNGKey(0)
    k_h, k_w, k_b, _ = jax.random.split(key, 4)

    # Synthetic backbone output (stands in for RobertaModel last_hidden_state).
    hidden = jax.random.normal(k_h, (B, S, D), dtype=jnp.float32)

    # Deterministic head params: nn.Linear(hidden_size, 2) per adapter name,
    # stacked in the native [out=2, in=D] layout -> (K, 2, D).
    head_w = 0.02 * jax.random.normal(k_w, (K, 2, D), dtype=jnp.float32)
    head_b = 0.02 * jax.random.normal(k_b, (K, 2), dtype=jnp.float32)

    # context_mask: a varying prefix of "context" tokens is True.
    lens = jnp.array([96, 80, 112, 64], dtype=jnp.int32)
    pos = jnp.arange(S)[None, :]
    context_mask = pos < lens[:, None]                       # (B, S) bool

    # datasets: adapter id per example (grouped, as Counter/BatchSplit implies).
    datasets = jnp.array([0, 0, 1, 1], dtype=jnp.int32)

    start_lp, end_lp = made_qa_heads(hidden, head_w, head_b, context_mask, datasets)
    jax.block_until_ready((start_lp, end_lp))

    # Correctness check against pure-JAX reference.
    ref_start, ref_end = reference_qa_heads(hidden, head_w, head_b, context_mask, datasets)
    np.testing.assert_allclose(np.asarray(start_lp), np.asarray(ref_start),
                               rtol=1e-4, atol=1e-4)
    np.testing.assert_allclose(np.asarray(end_lp), np.asarray(ref_end),
                               rtol=1e-4, atol=1e-4)

    # TODO(synk): RobertaModel backbone + Houlsby adapters and the optional
    # labels/marginal_ll loss (gather over answer spans) are not reproduced.
    print("KERNEL_OK")
</pallas_src>

<mosaic_0001>
module attributes {stable_mosaic.version = 11 : i64} {
  func.func @qa_head_kernel(%arg0: i32, %arg1: memref<4xi32, #tpu.memory_space<smem>>, %arg2: memref<1x128x64xf32, #tpu.memory_space<vmem>>, %arg3: memref<1x2x64xf32, #tpu.memory_space<vmem>>, %arg4: memref<2x2x1xf32, #tpu.memory_space<vmem>>, %arg5: memref<1x1x128xi32, #tpu.memory_space<vmem>>, %arg6: memref<1x2x128xf32, #tpu.memory_space<vmem>>) attributes {dimension_semantics = [#tpu.dimension_semantics<parallel>], iteration_bounds = array<i64: 4>, scalar_prefetch = 1 : i64, scratch_operands = 0 : i64, tpu.core_type = #tpu.core_type<tc>, window_params = [{transform_indices = @transform_0, window_bounds = array<i64: 1, 128, 64>}, {transform_indices = @transform_1, window_bounds = array<i64: 1, 2, 64>}, {pipeline_mode = #tpu.pipeline_mode<synchronous>, transform_indices = @transform_2, window_bounds = array<i64: 2, 2, 1>}, {transform_indices = @transform_3, window_bounds = array<i64: 1, 1, 128>}, {transform_indices = @transform_4, window_bounds = array<i64: 1, 2, 128>}]} {
    %0 = arith.index_cast %arg0 : i32 to index
    %1 = memref.load %arg1[%0] : memref<4xi32, #tpu.memory_space<smem>>
    %c0 = arith.constant 0 : index
    %c0_0 = arith.constant 0 : index
    %c0_1 = arith.constant 0 : index
    %2 = vector.load %arg2[%c0, %c0_0, %c0_1] : memref<1x128x64xf32, #tpu.memory_space<vmem>>, vector<1x128x64xf32>
    %3 = vector.shape_cast %2 : vector<1x128x64xf32> to vector<128x64xf32>
    %c0_2 = arith.constant 0 : index
    %c0_3 = arith.constant 0 : index
    %c0_4 = arith.constant 0 : index
    %4 = vector.load %arg3[%c0_2, %c0_3, %c0_4] : memref<1x2x64xf32, #tpu.memory_space<vmem>>, vector<1x2x64xf32>
    %5 = vector.shape_cast %4 : vector<1x2x64xf32> to vector<2x64xf32>
    %6 = arith.index_cast %1 : i32 to index
    %c0_5 = arith.constant 0 : index
    %c0_6 = arith.constant 0 : index
    %7 = vector.load %arg4[%6, %c0_5, %c0_6] : memref<2x2x1xf32, #tpu.memory_space<vmem>>, vector<1x2x1xf32>
    %8 = vector.shape_cast %7 : vector<1x2x1xf32> to vector<2x1xf32>
    %c0_7 = arith.constant 0 : index
    %c0_8 = arith.constant 0 : index
    %c0_9 = arith.constant 0 : index
    %9 = vector.load %arg5[%c0_7, %c0_8, %c0_9] : memref<1x1x128xi32, #tpu.memory_space<vmem>>, vector<1x1x128xi32>
    %10 = vector.shape_cast %9 : vector<1x1x128xi32> to vector<1x128xi32>
    %cst = arith.constant dense<0.000000e+00> : vector<2x128xf32>
    %11 = tpu.matmul %5, %3, %cst {dimension_numbers = #tpu.dot_dimension_numbers<[1], [1], [0], [0], [0, 0, 1, 0], [], []>} : vector<2x64xf32>, vector<128x64xf32>, vector<2x128xf32> -> vector<2x128xf32>
    %12 = vector.broadcast %8 : vector<2x1xf32> to vector<2x128xf32>
    %13 = arith.addf %11, %12 : vector<2x128xf32>
    %c0_i32 = arith.constant 0 : i32
    %14 = vector.broadcast %c0_i32 : i32 to vector<1x128xi32>
    %15 = arith.cmpi ne, %10, %14 : vector<1x128xi32>
    %cst_10 = arith.constant -1.000000e+09 : f32
    %16 = vector.shape_cast %15 : vector<1x128xi1> to vector<1x128xi1>
    %17 = vector.broadcast %16 : vector<1x128xi1> to vector<2x128xi1>
    %18 = vector.broadcast %cst_10 : f32 to vector<2x128xf32>
    %19 = arith.select %17, %13, %18 : vector<2x128xi1>, vector<2x128xf32>
    %cst_11 = arith.constant dense<0xFF800000> : vector<2xf32>
    %20 = vector.multi_reduction <maximumf>, %19, %cst_11 [1] : vector<2x128xf32> to vector<2xf32>
    %21 = vector.shape_cast %20 : vector<2xf32> to vector<2x1xf32>
    %22 = vector.broadcast %21 : vector<2x1xf32> to vector<2x128xf32>
    %23 = arith.subf %19, %22 : vector<2x128xf32>
    %24 = math.exp %23 : vector<2x128xf32>
    %cst_12 = arith.constant dense<0.000000e+00> : vector<2xf32>
    %25 = vector.multi_reduction <add>, %24, %cst_12 [1] : vector<2x128xf32> to vector<2xf32>
    %26 = vector.shape_cast %25 : vector<2xf32> to vector<2x1xf32>
    %27 = math.log %26 : vector<2x1xf32>
    %28 = arith.addf %27, %21 : vector<2x1xf32>
    %29 = vector.broadcast %28 : vector<2x1xf32> to vector<2x128xf32>
    %30 = arith.subf %19, %29 : vector<2x128xf32>
    %c0_13 = arith.constant 0 : index
    %c0_14 = arith.constant 0 : index
    %c0_15 = arith.constant 0 : index
    %31 = vector.load %arg6[%c0_13, %c0_14, %c0_15] : memref<1x2x128xf32, #tpu.memory_space<vmem>>, vector<1x2x128xf32>
    %32 = vector.shape_cast %31 : vector<1x2x128xf32> to vector<2x128xf32>
    %33 = vector.shape_cast %30 : vector<2x128xf32> to vector<1x2x128xf32>
    tpu.vector_store %arg6[%c0_13, %c0_14, %c0_15], %33 {strides = array<i32>} : memref<1x2x128xf32, #tpu.memory_space<vmem>>, vector<1x2x128xf32>,
    return
  }
  func.func @transform_0(%arg0: i32, %arg1: memref<4xi32, #tpu.memory_space<smem>>) -> (i32, i32, i32) {
    %c0_i32 = arith.constant 0 : i32
    %c0_i32_0 = arith.constant 0 : i32
    %c0_i32_1 = arith.constant 0 : i32
    return %arg0, %c0_i32, %c0_i32_0 : i32, i32, i32
  }
  func.func @transform_1(%arg0: i32, %arg1: memref<4xi32, #tpu.memory_space<smem>>) -> (i32, i32, i32) {
    %0 = arith.index_cast %arg0 : i32 to index
    %1 = memref.load %arg1[%0] : memref<4xi32, #tpu.memory_space<smem>>
    %c0_i32 = arith.constant 0 : i32
    %c0_i32_0 = arith.constant 0 : i32
    %c0_i32_1 = arith.constant 0 : i32
    return %1, %c0_i32, %c0_i32_0 : i32, i32, i32
  }
  func.func @transform_2(%arg0: i32, %arg1: memref<4xi32, #tpu.memory_space<smem>>) -> (i32, i32, i32) {
    %c0_i32 = arith.constant 0 : i32
    %c0_i32_0 = arith.constant 0 : i32
    %c0_i32_1 = arith.constant 0 : i32
    %c0_i32_2 = arith.constant 0 : i32
    return %c0_i32, %c0_i32_0, %c0_i32_1 : i32, i32, i32
  }
  func.func @transform_3(%arg0: i32, %arg1: memref<4xi32, #tpu.memory_space<smem>>) -> (i32, i32, i32) {
    %c0_i32 = arith.constant 0 : i32
    %c0_i32_0 = arith.constant 0 : i32
    %c0_i32_1 = arith.constant 0 : i32
    return %arg0, %c0_i32, %c0_i32_0 : i32, i32, i32
  }
  func.func @transform_4(%arg0: i32, %arg1: memref<4xi32, #tpu.memory_space<smem>>) -> (i32, i32, i32) {
    %c0_i32 = arith.constant 0 : i32
    %c0_i32_0 = arith.constant 0 : i32
    %c0_i32_1 = arith.constant 0 : i32
    return %arg0, %c0_i32, %c0_i32_0 : i32, i32, i32
  }
}

</mosaic_0001>

<bundles_post_ra>
// kernel: tpu_custom_call.1
= control target key start
LH: loop header
LB: loop body
LE: loop exit
PB: predicated region body
PF: predicated region fallthrough
CT: control target
= control target key end

     0   :  { %s615_s21 = smov [#allocation3]   ;;  %s781_s0 = inlined_call_operand.vmem [shape: s32[4], index: 0, kind: input, shape index: {}]   ;;  %s782_s1 = inlined_call_operand.vmem [shape: f32[4,128,64], index: 1, kind: input, shape index: {}]   ;;  %s783_s2 = inlined_call_operand.vmem [shape: f32[2,2,64], index: 2, kind: input, shape index: {}]   ;;  %s784_s3 = inlined_call_operand.vmem [shape: f32[2,2,1], index: 3, kind: input, shape index: {}]   ;;  %s785_s4 = inlined_call_operand.vmem [shape: s32[4,1,128], index: 4, kind: input, shape index: {}]   ;;  %s786_s5 = inlined_call_operand.hbm [shape: f32[4,2,128], index: 5, kind: output, shape index: {}]  }
   0x1   :  { %s11_s20 = sshll.u32 %s781_s0, 4  ;;  %s12_s20 = int_to_ptr.vmem [resolvable:$true] %s11_s20 }
   0x2   :  { %14 = dma.vmem_to_smem %s12_s20, 16, %s615_s21, [#allocation2] }
   0x3   :  { %593 = dma.done.wait [#allocation2], 16 }
   0x4   :  { %594 = vsyncadd [#allocation2], 4294967280 }
   0x5   :  { %17 = sfence }
   0x6   :  { %18 = vsyncpa [#allocation5], 0 }
   0x7   :  { %20 = vsyncpa [#allocation5 + $0x1], 0  ;;  %s650_s22 = smov 0   ;;  %s652_s23 = smov 0  }
   0x8   :  { %s654_s24 = smov 0   ;;  %s656_s25 = smov 0  }
   0x9 LB: > { %s671_s0 = sadd.s32 4294967295, %s613_s25   ;;  %s460_s26 = sadd.s32 4294967294, %s613_s25   ;;  %s613_s25 = sphi %s656_s25, %s792_s25   ;;  %s609_s24 = sphi %s654_s24, %s791_s24   ;;  %s605_s23 = sphi %s652_s23, %s790_s23   ;;  %s601_s22 = sphi %s650_s22, %s789_s22  }
   0xa   : > { %s675_s27 = sadd.s32 1, %s613_s25   ;;  %s134_s28 = sadd.s32 1, %s609_s24 }
   0xb   : > { %s131_s29 = ssub.s32 %s613_s25, %s675_s27  ;;  %p144_p0 = scmp.ne.s32.totalorder %s609_s24, %s605_s23 }
   0xc   : > { %p132_p1 = scmp.eq.s32.totalorder %s131_s29, 0  ;;  %p145_p2 = scmp.eq.s32.totalorder %s671_s0, 3 }
   0xd   : > { %p150_p3 = scmp.ne.s32.totalorder %s605_s23, %s601_s22  ;;  %p151_p4 = scmp.eq.s32.totalorder %s460_s26, 3 }
   0xe   : > { %s686_s30 = scalar_select %p132_p1, %s609_s24, %s134_s28  }
   0xf   : > { %p688_p5 = por %p145_p2, %p144_p0  ;;  %p692_p6 = por %p151_p4, %p150_p3 }
  0x10   : > { %p463_p7 = scmp.ge.s32.totalorder %s613_s25, 1  ;;  %p195_p8 = scmp.lt.s32.totalorder %s613_s25, 5 }
  0x12   : > { %p196_p9 = pnand %p463_p7, %p195_p8 }
  0x13   : > { %p229_p10 = scmp.lt.s32.totalorder (!%p196_p9), %s671_s0, 3  ;;  %s243_s13 = sld [smem:[#allocation3 + %s671_s0]] (!%p196_p9) }
  0x14   : > { %199 = sbr.rel (%p196_p9) target bundleno = 483 (0x1e3), region = 36  ;;  %s234_s21 = sld [smem:[#allocation3 + %s671_s0]] (!%p196_p9) }
  0x15   : > { %s487_s11 = sshll.u32 (!%p196_p9), %s671_s0, 1 }
  0x19   : > { %s230_s8 = scalar_select %p229_p10, %s671_s0, 3  ;;  %vm270_vm0 = vcmask 523264   ;;  %v616_v11 = vmov 0   ;;  %vm347_vm3 = vcmask 1041408  }
  0x1a   : > { %s468_s14 = sshll.u32 %s243_s13, 1  ;;  %532 = vset.pattern.permute.xlu0 %v616_v11  ;;  %p235_p11 = scmp.lt.s32.totalorder %s234_s21, 1 }
  0x1b   : > { %s490_s9 = sshll.u32 %s230_s8, 7  ;;  %s242_s17 = scalar_lea.vmem %s785_s4, %s230_s8 }
  0x1c   : > { %s703_s12 = scalar_lea.vmem %s782_s1, %s490_s9  ;;  %s262_s20 = scalar_lea.vmem %s784_s3, %s468_s14  ;;  %v264_v9 = vld [vmem:[%s242_s17] sm:$0x1] }
  0x1d   : > { %v259_v0 = vld [vmem:[%s703_s12 + $0x78] sm:$0xff]  ;;  %v258_v1 = vld [vmem:[%s703_s12 + $0x70] sm:$0xff]  ;;  %v257_v2 = vld [vmem:[%s703_s12 + $0x68] sm:$0xff]  ;;  %vm342_vm1 = vcmp.ne.s32.totalorder %v264_v9, 0  ;;  %s794_s21 = smov (!%p235_p11, %s234_s21), 1  ;;  %s226_s9 = sand.u32 1, %s605_s23  }
  0x1e   : > { %469 = vmatpush.xpose.msk.msra.mxu0 %vm270_vm0, %v259_v0  ;;  %v256_v3 = vld [vmem:[%s703_s12 + $0x60] sm:$0xff]  ;;  %v255_v4 = vld [vmem:[%s703_s12 + $0x58] sm:$0xff]  ;;  %v254_v5 = vld [vmem:[%s703_s12 + $0x50] sm:$0xff]  ;;  %v343_v13 = vsel %vm342_vm1, 1, %v616_v11  ;;  %s467_s26 = sshll.u32 %s794_s21, 1  ;;  %s464_s10 = sshll.u32 %s226_s9, 1 }
  0x1f   : > { %v253_v6 = vld [vmem:[%s703_s12 + $0x48] sm:$0xff]  ;;  %v252_v7 = vld [vmem:[%s703_s12 + $0x40] sm:$0xff]  ;;  %v251_v8 = vld [vmem:[%s703_s12 + $0x38] sm:$0xff]  ;;  %s238_s8 = scalar_lea.vmem %s783_s2, %s467_s26  ;;  %v344_v21 = vperm.slane %v343_v13, 0  ;;  %s373_s14 = scalar_lea.hbm %s786_s5, %s487_s11 }
  0x20   : > { %v263_v10 = vld [vmem:[%s262_s20] sm:$0x3]  ;;  %v250_v12 = vld [vmem:[%s703_s12 + $0x30] sm:$0xff]  ;;  %v249_v14 = vld [vmem:[%s703_s12 + $0x28] sm:$0xff]  ;;  %s228_s15 = scalar_lea.vmem [#allocation4], %s464_s10  ;;  %s377_s17 = sshll.u32 %s373_s14, 4  ;;  %s378_s17 = int_to_ptr.hbm [resolvable:$true] %s377_s17 }
  0x21   : > { %267 = vperm.xlu0 %532, %v263_v10   ;;  %v248_v15 = vld [vmem:[%s703_s12 + $0x20] sm:$0xff]  ;;  %v247_v16 = vld [vmem:[%s703_s12 + $0x18] sm:$0xff]  ;;  %v246_v17 = vld [vmem:[%s703_s12 + $0x10] sm:$0xff]  ;;  %vm345_vm2 = vcmp.eq.s32.totalorder %v344_v21, 1  ;;  %s375_s16 = sshll.u32 %s228_s15, 4  ;;  %s363_s18 = scalar_lea.sflag [#allocation5], %s226_s9  ;;  %s376_s16 = int_to_ptr.vmem [resolvable:$true] %s375_s16 }
  0x22   : > { %470 = vmatpush.xpose.msk.msra.mxu0 %vm270_vm0, %v258_v1  ;;  %v245_v18 = vld [vmem:[%s703_s12 + $0x8] sm:$0xff]  ;;  %v244_v19 = vld [vmem:[%s703_s12] sm:$0xff]  ;;  %s563_s19 = sshra.s32 %s378_s17, 4  ;;  %s569_s26 = scalar_lea.hbm %s786_s5, 8  ;;  %s564_s19 = int_to_ptr.hbm [resolvable:$true] %s563_s19 }
  0x23   : > { %v260_v20 = vld [vmem:[%s238_s8] sm:$0x3]  ;;  %s565_s20 = scalar_lea.hbm %s564_s19, 2  ;;  %p570_p1 = scmp.lt.s32.totalorder %s564_s19, %s786_s5 }
  0x24   : > { %p566_p12 = scmp.ne.s32.totalorder %s564_s19, %s565_s20  ;;  %p571_p2 = scmp.lt.s32.totalorder %s569_s26, %s565_s20 }
  0x26   : > { %471 = vmatpush.xpose.msk.msra.mxu0 %vm270_vm0, %v257_v2  ;;  %p567_p13 = pnand %p566_p12, %p688_p5  ;;  %p572_p3 = por %p571_p2, %p570_p1 }
  0x28   : > { %p568_p0 = pneg %p567_p13 }
  0x2a   : > { %472 = vmatpush.xpose.msk.msra.mxu0 %vm270_vm0, %v256_v3  ;;  %p573_p4 = pnand %p572_p3, %p568_p0 }
  0x2e   : > { %473 = vmatpush.xpose.msk.msra.mxu0 %vm270_vm0, %v255_v4 }
  0x32   : > { %474 = vmatpush.xpose.msk.msra.mxu0 %vm270_vm0, %v254_v5 }
  0x36   : > { %475 = vmatpush.xpose.msk.msra.mxu0 %vm270_vm0, %v253_v6 }
  0x3a   : > { %476 = vmatpush.xpose.msk.msra.mxu0 %vm270_vm0, %v252_v7 }
  0x3e   : > { %477 = vmatpush.xpose.msk.msra.mxu0 %vm270_vm0, %v251_v8 }
  0x42   : > { %478 = vmatpush.xpose.msk.msra.mxu0 %vm270_vm0, %v250_v12 }
  0x46   : > { %479 = vmatpush.xpose.msk.msra.mxu0 %vm270_vm0, %v249_v14 }
  0x4a   : > { %480 = vmatpush.xpose.msk.msra.mxu0 %vm270_vm0, %v248_v15 }
  0x4e   : > { %481 = vmatpush.xpose.msk.msra.mxu0 %vm270_vm0, %v247_v16 }
  0x52   : > { %482 = vmatpush.xpose.msk.msra.mxu0 %vm270_vm0, %v246_v17 }
  0x56   : > { %483 = vmatpush.xpose.msk.msra.mxu0 %vm270_vm0, %v245_v18 }
  0x5a   : > { %484 = vmatpush.xpose.msk.msra.mxu0 %vm270_vm0, %v244_v19 }
  0x5d   : > { %485 = vmatmul.msk.f32.vlgmr.msra.gmra.mxu0 %vm270_vm0, %v260_v20 }
  0x93   : > { %v268_v22 = vpop.permute.xlu0 %267 }
  0xda   : > { %v339_v23 = vpop.f32.mrf.mxu0 }
  0xdb   : > { %v340_v24 = vadd.f32 %v339_v23, %v268_v22 }
  0xdd   : > { %v346_v25 = vsel %vm345_vm2, %v340_v24, -1e+09 }
  0xde   : > { %v348_v26 = vsel %vm347_vm3, %v346_v25, -inf }
  0xdf   : > { %349 = vmax.xlane.f32.xlu0 %v348_v26 }
 0x152   : > { %v350_v27 = vpop.xlane.xlu0 %349 }
 0x153   : > { %v351_v28 = vsub.f32 %v346_v25, %v350_v27 }
 0x155   : > { %v352_v29 = vmul.f32 1.442695, %v351_v28 }
 0x157   : > { %533 = vpow2.f32 %v352_v29 }
 0x15d   : > { %v534_v30 = vpop.eup %533 }
 0x15e   : > { %v354_v31 = vsel %vm347_vm3, %v534_v30, 0.0 }
 0x15f   : > { %355 = vadd.xlane.f32.xlu1 %v354_v31 }
 0x1d2   : > { %v356_v32 = vpop.xlane.xlu1 %355 }
 0x1d3   : > { %535 = vlog2.f32 %v356_v32 }
 0x1d9   : > { %v536_v33 = vpop.eup %535 }
 0x1da   : > { %v358_v34 = vmul.f32 0.6931472, %v536_v33 }
 0x1dc   : > { %v359_v35 = vadd.f32 %v358_v34, %v350_v27 }
 0x1de   : > { %v360_v36 = vsub.f32 %v346_v25, %v359_v35 }
 0x1e0   : > { %361 = vst [vmem:[%s228_s15] sm:$0x3] %v360_v36 }
 0x1e1   : > { %576 = shalt.err (!%p573_p4)
}
 0x1e2   : > { %491 = dma.vmem_to_hbm [thread:$0]  (%p688_p5), %s376_s16, 32, %s378_s17, %s363_s18  }
 0x1e3 PF: > { %p497_p7 = scmp.ge.s32.totalorder %s613_s25, 2  ;;  %s389_s8 = sand.u32 1, %s601_s22  }
 0x1e4   : > { %s390_s9 = scalar_lea.sflag [#allocation5], %s389_s8 }
 0x1e5   : > { %p494_p8 = pnand %p497_p7, %p692_p6 }
 0x1e7   : > { %p495_p9 = pneg %p494_p8 }
 0x1e9   : > { %596 = dma.done.wait (%p495_p9), %s390_s9, 32  }
 0x1ea   : > { %598 = vsyncadd (%p495_p9), %s390_s9, 4294967264  ;;  %p23_p10 = scmp.ge.s32.totalorder %s675_s27, 6   ;;  %s789_s22 = smov %s605_s23 }
 0x1eb   : > { %s790_s23 = smov %s609_s24  ;;  %s791_s24 = smov %s686_s30 }
 0x1ec   : > { %s792_s25 = smov %s675_s27  ;;  %25 = sbr.rel (!%p23_p10) target bundleno = 9 (0x9), region = 78 }
 0x1f1   :  { %396 = vsyncpa [#allocation5], 1 }
 0x1f2   :  { %398 = vsyncpa [#allocation5 + $0x1], 1 }

</bundles_post_ra>
